<compile_context>
chip_gen: v7x
topology: tpu7x:2x2x1
jax: 0.10.0
libtpu: 0.0.40
codegen_flags: <defaults>
</compile_context>

<pallas_src>
import jax
import jax.numpy as jnp
from jax.experimental import pallas as pl
from jax.experimental.pallas import tpu as pltpu

_MiB = 1024 * 1024


def _vmem_limit_bytes():
    try:
        cap = pltpu.get_tpu_info().vmem_capacity_bytes
    except Exception:
        cap = 64 * _MiB  # conservative fallback (v7x per-TC VMEM)
    # v5e/v6e (128 MiB physical) -> 96 MiB scoped; v7x (64 MiB) -> 48 MiB.
    return int(min(cap * 3 // 4, 96 * _MiB))


def _pick_seq_tile(B, T, D, x_itemsize, budget_bytes):
    """Largest power-of-two seq tile whose footprint fits the budget.

    Footprint = double-buffered in + out tiles in x.dtype (4*TT*D*itemsize)
    plus the in-kernel f32 working set (~3*TT*D*4: x_f32, centered, result).
    """
    if T <= 8:
        return T
    tt = 8
    for cand in (1024, 512, 256, 128, 64, 32, 16, 8):
        if cand > T:
            continue
        footprint = 4 * cand * D * x_itemsize + 3 * cand * D * 4
        if footprint <= budget_bytes:
            tt = cand
            break
    # v7x has 2 TensorCores: keep >= ~4 parallel grid blocks when possible,
    # but never drop below 128 (per-step overhead dominates below that).
    while tt > 128 and B * pl.cdiv(T, tt) < 4:
        tt //= 2
    return tt


def _pick_col_tile(D, w_itemsize, budget_bytes):
    """Column tile for the two (D, D) weight halves (each double-buffered)."""
    if D % 128 != 0:
        return D  # tiny / odd D: single full-width block
    for cand in (2048, 1024, 512, 256, 128):
        if cand <= D and 4 * D * cand * w_itemsize <= budget_bytes:
            return cand
    return 128


# ---------------------------------------------------------------------------
# Kernel 1: scale = SiLU(emb) @ Ws + bs ; shift = SiLU(emb) @ Wsh + bsh
# SiLU is precomputed in the wrapper (hoisted out of the column loop); the
# grid streams column tiles of the two weight halves through the MXU.
# ---------------------------------------------------------------------------
def _proj_kernel(e_ref, ws_ref, wsh_ref, bs_ref, bsh_ref, scale_ref, shift_ref):
    e = e_ref[...]  # (B, D), already SiLU'd, in the weight's native dtype
    scale_ref[...] = (
        jnp.dot(e, ws_ref[...], preferred_element_type=jnp.float32)
        + bs_ref[...].astype(jnp.float32)
    ).astype(scale_ref.dtype)
    shift_ref[...] = (
        jnp.dot(e, wsh_ref[...], preferred_element_type=jnp.float32)
        + bsh_ref[...].astype(jnp.float32)
    ).astype(shift_ref.dtype)


# ---------------------------------------------------------------------------
# Kernel 2: per-row LayerNorm (no affine, eps=1e-6) + adaptive scale/shift.
# x tile is (TT, D); scale/shift are lane-dense (1, D) per-batch rows.
# ---------------------------------------------------------------------------
def _modulate_kernel(x_ref, scale_ref, shift_ref, o_ref):
    x = x_ref[...].astype(jnp.float32)                 # (TT, D)
    mean = jnp.mean(x, axis=-1, keepdims=True)
    xc = x - mean
    var = jnp.mean(xc * xc, axis=-1, keepdims=True)    # two-pass (stable)
    xn = xc * jax.lax.rsqrt(var + 1e-6)
    scale = scale_ref[...].astype(jnp.float32)         # (1, D) broadcasts
    shift = shift_ref[...].astype(jnp.float32)
    o_ref[...] = (xn * (1.0 + scale) + shift).astype(o_ref.dtype)


def ada_layernorm_zero_final(x, emb, w, bias):
    """x: (B, T, D); emb: (B, D); w: (D, 2D) = nn.Linear.weight.T; bias: (2D,)."""
    B, T, D = x.shape
    assert emb.shape == (B, D) and w.shape == (D, 2 * D) and bias.shape == (2 * D,)

    vmem_limit = _vmem_limit_bytes()
    tile_budget = max(vmem_limit - 8 * _MiB, 8 * _MiB)

    # ---- SiLU hoisted out of the column loop (tiny (B, D), done once) ----
    e32 = emb.astype(jnp.float32)
    e = (e32 * jax.nn.sigmoid(e32)).astype(w.dtype)

    # Split the fused projection into scale/shift halves so the kernel emits
    # lane-dense per-batch rows directly (no XLA slice of a fused buffer).
    w_s, w_sh = w[:, :D], w[:, D:]
    b_s = bias[:D].reshape(1, D)
    b_sh = bias[D:].reshape(1, D)

    tn = _pick_col_tile(D, jnp.dtype(w.dtype).itemsize, tile_budget)
    n_col = pl.cdiv(D, tn)

    scale, shift = pl.pallas_call(
        _proj_kernel,
        out_shape=(jax.ShapeDtypeStruct((B, D), jnp.float32),
                   jax.ShapeDtypeStruct((B, D), jnp.float32)),
        grid=(n_col,),
        in_specs=[
            pl.BlockSpec((B, D), lambda n: (0, 0)),    # SiLU(emb), tiny, re-read
            pl.BlockSpec((D, tn), lambda n: (0, n)),   # scale-weight columns
            pl.BlockSpec((D, tn), lambda n: (0, n)),   # shift-weight columns
            pl.BlockSpec((1, tn), lambda n: (0, n)),   # scale bias
            pl.BlockSpec((1, tn), lambda n: (0, n)),   # shift bias
        ],
        out_specs=(pl.BlockSpec((B, tn), lambda n: (0, n)),
                   pl.BlockSpec((B, tn), lambda n: (0, n))),
        compiler_params=pltpu.CompilerParams(
            dimension_semantics=("parallel",),
            vmem_limit_bytes=vmem_limit),
    )(e, w_s, w_sh, b_s, b_sh)

    # Metadata-only reshape so the modulate BlockSpecs keep the (8,128) rule
    # trivially satisfied: (B, 1, D) blocks of (Squeezed, 1, D).
    scale3 = scale.reshape(B, 1, D)
    shift3 = shift.reshape(B, 1, D)

    # ---- LayerNorm + modulation, tiled over (batch, seq) with cdiv grid ----
    TT = _pick_seq_tile(B, T, D, jnp.dtype(x.dtype).itemsize, tile_budget)
    n_seq = pl.cdiv(T, TT)  # ragged last tile is masked on writeback

    out = pl.pallas_call(
        _modulate_kernel,
        out_shape=jax.ShapeDtypeStruct((B, T, D), x.dtype),
        grid=(B, n_seq),
        in_specs=[
            pl.BlockSpec((pl.Squeezed(), TT, D), lambda b, t: (b, t, 0)),
            pl.BlockSpec((pl.Squeezed(), 1, D), lambda b, t: (b, 0, 0)),
            pl.BlockSpec((pl.Squeezed(), 1, D), lambda b, t: (b, 0, 0)),
        ],
        out_specs=pl.BlockSpec((pl.Squeezed(), TT, D), lambda b, t: (b, t, 0)),
        compiler_params=pltpu.CompilerParams(
            dimension_semantics=("parallel", "parallel"),
            vmem_limit_bytes=vmem_limit),
    )(x, scale3, shift3)
    return out


def _reference(x, emb, w, bias):
    e = emb * jax.nn.sigmoid(emb)
    proj = e @ w + bias
    D = x.shape[-1]
    scale, shift = proj[:, :D], proj[:, D:]
    mean = jnp.mean(x, axis=-1, keepdims=True)
    var = jnp.mean((x - mean) ** 2, axis=-1, keepdims=True)
    xn = (x - mean) / jnp.sqrt(var + 1e-6)
    return xn * (1.0 + scale)[:, None, :] + shift[:, None, :]


if __name__ == "__main__":
    key = jax.random.PRNGKey(0)

    def make_inputs(k, B, T, D):
        kx, ke, kw, kb = jax.random.split(k, 4)
        x = jax.random.normal(kx, (B, T, D), dtype=jnp.float32)
        emb = jax.random.normal(ke, (B, D), dtype=jnp.float32)
        bound = 1.0 / (D ** 0.5)  # nn.Linear default init, stored transposed
        w = jax.random.uniform(kw, (D, 2 * D), minval=-bound, maxval=bound,
                               dtype=jnp.float32)
        bias = jax.random.uniform(kb, (2 * D,), minval=-bound, maxval=bound,
                                  dtype=jnp.float32)
        return x, emb, w, bias

    k1, k2 = jax.random.split(key)

    # Case 1: tiny full-block path (B=2, T=8, D=32).
    x, emb, w, bias = make_inputs(k1, 2, 8, 32)
    out = jax.block_until_ready(ada_layernorm_zero_final(x, emb, w, bias))
    ref = _reference(x, emb, w, bias)
    assert out.shape == x.shape
    assert jnp.allclose(out, ref, atol=1e-4, rtol=1e-4), "case1 mismatch vs reference"

    # Case 2: exercises the tiled / ragged-seq path (T=200 -> TT=128, cdiv grid).
    x, emb, w, bias = make_inputs(k2, 2, 200, 256)
    out = jax.block_until_ready(ada_layernorm_zero_final(x, emb, w, bias))
    ref = _reference(x, emb, w, bias)
    assert out.shape == x.shape
    assert jnp.allclose(out, ref, atol=1e-4, rtol=1e-4), "case2 mismatch vs reference"

    print("KERNEL_OK")
</pallas_src>

<mosaic_0001>
module attributes {stable_mosaic.version = 11 : i64} {
  func.func @_proj_kernel(%arg0: i32, %arg1: memref<2x32xf32, #tpu.memory_space<vmem>>, %arg2: memref<32x32xf32, #tpu.memory_space<vmem>>, %arg3: memref<32x32xf32, #tpu.memory_space<vmem>>, %arg4: memref<1x32xf32, #tpu.memory_space<vmem>>, %arg5: memref<1x32xf32, #tpu.memory_space<vmem>>, %arg6: memref<2x32xf32, #tpu.memory_space<vmem>>, %arg7: memref<2x32xf32, #tpu.memory_space<vmem>>) attributes {dimension_semantics = [#tpu.dimension_semantics<parallel>], iteration_bounds = array<i64: 1>, scalar_prefetch = 0 : i64, scratch_operands = 0 : i64, tpu.core_type = #tpu.core_type<tc>, window_params = [{pipeline_mode = #tpu.pipeline_mode<synchronous>, transform_indices = @transform_0, window_bounds = array<i64: 2, 32>}, {transform_indices = @transform_1, window_bounds = array<i64: 32, 32>}, {transform_indices = @transform_2, window_bounds = array<i64: 32, 32>}, {transform_indices = @transform_3, window_bounds = array<i64: 1, 32>}, {transform_indices = @transform_4, window_bounds = array<i64: 1, 32>}, {transform_indices = @transform_5, window_bounds = array<i64: 2, 32>}, {transform_indices = @transform_6, window_bounds = array<i64: 2, 32>}]} {
    %c0 = arith.constant 0 : index
    %c0_0 = arith.constant 0 : index
    %0 = vector.load %arg1[%c0, %c0_0] : memref<2x32xf32, #tpu.memory_space<vmem>>, vector<2x32xf32>
    %c0_1 = arith.constant 0 : index
    %c0_2 = arith.constant 0 : index
    %1 = vector.load %arg2[%c0_1, %c0_2] : memref<32x32xf32, #tpu.memory_space<vmem>>, vector<32x32xf32>
    %cst = arith.constant dense<0.000000e+00> : vector<2x32xf32>
    %2 = tpu.matmul %0, %1, %cst {dimension_numbers = #tpu.dot_dimension_numbers<[1], [0], [0], [1], [0, 0, 1, 1], [], []>} : vector<2x32xf32>, vector<32x32xf32>, vector<2x32xf32> -> vector<2x32xf32>
    %c0_3 = arith.constant 0 : index
    %c0_4 = arith.constant 0 : index
    %3 = vector.load %arg4[%c0_3, %c0_4] : memref<1x32xf32, #tpu.memory_space<vmem>>, vector<1x32xf32>
    %4 = vector.broadcast %3 : vector<1x32xf32> to vector<2x32xf32>
    %5 = arith.addf %2, %4 : vector<2x32xf32>
    %c0_5 = arith.constant 0 : index
    %c0_6 = arith.constant 0 : index
    %6 = vector.load %arg6[%c0_5, %c0_6] : memref<2x32xf32, #tpu.memory_space<vmem>>, vector<2x32xf32>
    tpu.vector_store %arg6[%c0_5, %c0_6], %5 {strides = array<i32>} : memref<2x32xf32, #tpu.memory_space<vmem>>, vector<2x32xf32>,
    %c0_7 = arith.constant 0 : index
    %c0_8 = arith.constant 0 : index
    %7 = vector.load %arg3[%c0_7, %c0_8] : memref<32x32xf32, #tpu.memory_space<vmem>>, vector<32x32xf32>
    %cst_9 = arith.constant dense<0.000000e+00> : vector<2x32xf32>
    %8 = tpu.matmul %0, %7, %cst_9 {dimension_numbers = #tpu.dot_dimension_numbers<[1], [0], [0], [1], [0, 0, 1, 1], [], []>} : vector<2x32xf32>, vector<32x32xf32>, vector<2x32xf32> -> vector<2x32xf32>
    %c0_10 = arith.constant 0 : index
    %c0_11 = arith.constant 0 : index
    %9 = vector.load %arg5[%c0_10, %c0_11] : memref<1x32xf32, #tpu.memory_space<vmem>>, vector<1x32xf32>
    %10 = vector.broadcast %9 : vector<1x32xf32> to vector<2x32xf32>
    %11 = arith.addf %8, %10 : vector<2x32xf32>
    %c0_12 = arith.constant 0 : index
    %c0_13 = arith.constant 0 : index
    %12 = vector.load %arg7[%c0_12, %c0_13] : memref<2x32xf32, #tpu.memory_space<vmem>>, vector<2x32xf32>
    tpu.vector_store %arg7[%c0_12, %c0_13], %11 {strides = array<i32>} : memref<2x32xf32, #tpu.memory_space<vmem>>, vector<2x32xf32>,
    return
  }
  func.func @transform_0(%arg0: i32) -> (i32, i32) {
    %c0_i32 = arith.constant 0 : i32
    %c0_i32_0 = arith.constant 0 : i32
    %c0_i32_1 = arith.constant 0 : i32
    return %c0_i32, %c0_i32_0 : i32, i32
  }
  func.func @transform_1(%arg0: i32) -> (i32, i32) {
    %c0_i32 = arith.constant 0 : i32
    %c0_i32_0 = arith.constant 0 : i32
    return %c0_i32, %arg0 : i32, i32
  }
  func.func @transform_2(%arg0: i32) -> (i32, i32) {
    %c0_i32 = arith.constant 0 : i32
    %c0_i32_0 = arith.constant 0 : i32
    return %c0_i32, %arg0 : i32, i32
  }
  func.func @transform_3(%arg0: i32) -> (i32, i32) {
    %c0_i32 = arith.constant 0 : i32
    %c0_i32_0 = arith.constant 0 : i32
    return %c0_i32, %arg0 : i32, i32
  }
  func.func @transform_4(%arg0: i32) -> (i32, i32) {
    %c0_i32 = arith.constant 0 : i32
    %c0_i32_0 = arith.constant 0 : i32
    return %c0_i32, %arg0 : i32, i32
  }
  func.func @transform_5(%arg0: i32) -> (i32, i32) {
    %c0_i32 = arith.constant 0 : i32
    %c0_i32_0 = arith.constant 0 : i32
    return %c0_i32, %arg0 : i32, i32
  }
  func.func @transform_6(%arg0: i32) -> (i32, i32) {
    %c0_i32 = arith.constant 0 : i32
    %c0_i32_0 = arith.constant 0 : i32
    return %c0_i32, %arg0 : i32, i32
  }
}

</mosaic_0001>

<bundles_post_ra>
// kernel: tpu_custom_call.1
= control target key start
LH: loop header
LB: loop body
LE: loop exit
PB: predicated region body
PF: predicated region fallthrough
CT: control target
= control target key end

     0   :  { %12 = vsyncpa [#allocation3], 0  ;;  %s558_s0 = inlined_call_operand.hbm [shape: f32[2,32], index: 0, kind: input, shape index: {}]   ;;  %s559_s1 = inlined_call_operand.hbm [shape: f32[32,32], index: 1, kind: input, shape index: {}]   ;;  %s560_s2 = inlined_call_operand.hbm [shape: f32[32,32], index: 2, kind: input, shape index: {}]   ;;  %s561_s3 = inlined_call_operand.vmem [shape: f32[1,32], index: 3, kind: input, shape index: {}]   ;;  %s562_s4 = inlined_call_operand.vmem [shape: f32[1,32], index: 4, kind: input, shape index: {}]   ;;  %s563_s5 = inlined_call_operand.hbm [shape: f32[2,32], index: 5, kind: output, shape index: {0}]   ;;  %s564_s6 = inlined_call_operand.hbm [shape: f32[2,32], index: 6, kind: output, shape index: {1}]  }
   0x1   :  { %13 = vsyncpa [#allocation6], 0 }
   0x2   :  { %14 = vsyncpa [#allocation4], 0 }
   0x3   :  { %15 = vsyncpa [#allocation10], 0  ;;  %s439_s21 = smov [#allocation5]   ;;  %s321_s25 = scalar_lea.hbm %s559_s1, 512 }
   0x4   :  { %s31_s22 = sshll.u32 %s439_s21, 4  ;;  %p322_p0 = scmp.ne.s32.totalorder %s559_s1, %s321_s25  ;;  %s32_s22 = int_to_ptr.vmem [resolvable:$true] %s31_s22 }
   0x5   :  { %p325_p1 = scmp.lt.u32.totalorder %s321_s25, %s559_s1 }
   0x7   :  { %p327_p2 = pnand %p325_p1, %p322_p0 }
   0x9   :  { %330 = shalt.err (!%p327_p2)
}
   0xa   :  { %s331_s30 = scalar_lea.vmem %s32_s22, 512  ;;  %p336_p4 = scmp.lt.s32.totalorder %s32_s22, %s32_s22 }
   0xb   :  { %p332_p3 = scmp.ne.s32.totalorder %s32_s22, %s331_s30  ;;  %p337_p5 = scmp.lt.s32.totalorder %s331_s30, %s331_s30 }
   0xd   :  { %p338_p6 = por %p337_p5, %p336_p4 }
   0xf   :  { %p339_p7 = pnand %p338_p6, %p332_p3 }
  0x11   :  { %342 = shalt.err (!%p339_p7)
}
  0x12   :  { %s440_s7 = smov 128   ;;  %s441_s8 = smov 8  }
  0x13   :  { %37 = dma.hbm_to_vmem [thread:$0]  %s559_s1, 512, %s32_s22, [#allocation6], %s440_s7, %s440_s7, %s441_s8  }
  0x14   :  { %s442_s11 = smov [#allocation2]   ;;  %s443_s13 = smov [#allocation7]  }
  0x15   :  { %s22_s12 = sshll.u32 %s442_s11, 4  ;;  %s43_s14 = sshll.u32 %s443_s13, 4  ;;  %s23_s12 = int_to_ptr.vmem [resolvable:$true] %s22_s12  ;;  %s44_s14 = int_to_ptr.vmem [resolvable:$true] %s43_s14 }
  0x16   :  { %s343_s17 = scalar_lea.hbm %s558_s0, 32 }
  0x17   :  { %p344_p8 = scmp.ne.s32.totalorder %s558_s0, %s343_s17  ;;  %p347_p9 = scmp.lt.u32.totalorder %s343_s17, %s558_s0 }
  0x19   :  { %p349_p10 = pnand %p347_p9, %p344_p8 }
  0x1b   :  { %352 = shalt.err (!%p349_p10)
}
  0x1c   :  { %s353_s1 = scalar_lea.vmem %s23_s12, 32  ;;  %p358_p12 = scmp.lt.s32.totalorder %s23_s12, %s23_s12 }
  0x1d   :  { %p354_p11 = scmp.ne.s32.totalorder %s23_s12, %s353_s1  ;;  %p359_p13 = scmp.lt.s32.totalorder %s353_s1, %s353_s1 }
  0x1f   :  { %p360_p0 = por %p359_p13, %p358_p12 }
  0x21   :  { %p361_p1 = pnand %p360_p0, %p354_p11 }
  0x23   :  { %364 = shalt.err (!%p361_p1)
}
  0x24   :  { %25 = dma.hbm_to_vmem [thread:$0]  %s558_s0, 32, %s23_s12, [#allocation3]  }
  0x25   :  { %s365_s26 = scalar_lea.hbm %s560_s2, 512 }
  0x26   :  { %p366_p2 = scmp.ne.s32.totalorder %s560_s2, %s365_s26  ;;  %p369_p3 = scmp.lt.u32.totalorder %s365_s26, %s560_s2 }
  0x28   :  { %p371_p4 = pnand %p369_p3, %p366_p2 }
  0x2a   :  { %374 = shalt.err (!%p371_p4)
}
  0x2b   :  { %s375_s9 = scalar_lea.vmem %s44_s14, 512  ;;  %p380_p6 = scmp.lt.s32.totalorder %s44_s14, %s44_s14 }
  0x2c   :  { %p376_p5 = scmp.ne.s32.totalorder %s44_s14, %s375_s9  ;;  %p381_p7 = scmp.lt.s32.totalorder %s375_s9, %s375_s9 }
  0x2e   :  { %p382_p8 = por %p381_p7, %p380_p6 }
  0x30   :  { %p383_p9 = pnand %p382_p8, %p376_p5 }
  0x32   :  { %386 = shalt.err (!%p383_p9)
}
  0x33   :  { %49 = dma.hbm_to_vmem [thread:$0]  %s560_s2, 512, %s44_s14, [#allocation6], %s440_s7, %s440_s7, %s441_s8  }
  0x34   :  { %431 = dma.done.wait [#allocation3], 32  }
  0x35   :  { %432 = vsyncadd [#allocation3], 4294967264 }
  0x36   :  { %433 = dma.done.wait [#allocation6], 1024  }
  0x37   :  { %434 = vsyncadd [#allocation6], 4294966272  ;;  %v444_v0 = vmov 0.0|0.0   ;;  %vm445_vm0 = vmmov 0   ;;  %v446_v1 = vmov 0.0   ;;  %v64_v2 = vld [vmem:[#allocation5] sm:$0xff] }
  0x38   :  { %299 = vmatprep.subr.bf16.mxu0 %v444_v0  ;;  %305 = vmatprep.subr.bf16.mxu1 %v444_v0  ;;  %v65_v3 = vld [vmem:[#allocation5 + $0x8] sm:$0xff]  ;;  %v151_v4 = vld [vmem:[#allocation7] sm:$0xff]  ;;  %v66_v7 = vld [vmem:[#allocation5 + $0x10] sm:$0xff]  ;;  %vm75_vm1 = vcmask 261120   ;;  %s447_s8 = smov [#allocation8]   ;;  %s448_s14 = smov [#allocation9]  }
  0x39   :  { %285 = vmatprep.mubr.msk.f32.mxu0 %vm445_vm0, %v446_v1  ;;  %296 = vmatprep.mubr.msk.f32.mxu1 %vm445_vm0, %v446_v1  ;;  %v300_v5 = vpack.c.bf16 %v65_v3, %v64_v2  ;;  %v152_v6 = vld [vmem:[#allocation7 + $0x8] sm:$0xff]  ;;  %v67_v8 = vld [vmem:[#allocation5 + $0x18] sm:$0xff]  ;;  %v153_v10 = vld [vmem:[#allocation7 + $0x10] sm:$0xff]  ;;  %s239_s11 = sshll.u32 %s447_s8, 4  ;;  %s249_s15 = sshll.u32 %s448_s14, 4  ;;  %vm149_vm2 = vcmask 254976   ;;  %s240_s11 = int_to_ptr.vmem [resolvable:$true] %s239_s11  ;;  %s250_s15 = int_to_ptr.vmem [resolvable:$true] %s249_s15 }
  0x3a   :  { %v306_v9 = vpack.c.bf16 %v152_v6, %v151_v4  ;;  %v154_v11 = vld [vmem:[#allocation7 + $0x18] sm:$0xff]  ;;  %v303_v12 = vpack.c.bf16 %v67_v8, %v66_v7  ;;  %p392_p11 = scmp.lt.s32.totalorder %s240_s11, %s240_s11 }
  0x3b   :  { %301 = vmatpush3.bf16.msra.mxu0 %v300_v5  ;;  %v309_v13 = vpack.c.bf16 %v154_v11, %v153_v10  ;;  %v63_v14 = vld [vmem:[#allocation2] sm:$0x3] }
  0x3c   :  { %307 = vmatpush3.bf16.msra.mxu1 %v306_v9  ;;  %302 = vmatprep.subr.bf16.mxu0 %v444_v0  ;;  %v263_v15 = vld [vmem:[%s561_s3] ss:$0 sm:$0xff]  ;;  %s387_s3 = scalar_lea.vmem %s240_s11, 32 }
  0x3d   :  { %308 = vmatprep.subr.bf16.mxu1 %v444_v0  ;;  %v265_v16 = vld [vmem:[%s562_s4] ss:$0 sm:$0xff]  ;;  %p388_p10 = scmp.ne.s32.totalorder %s240_s11, %s387_s3  ;;  %p393_p12 = scmp.lt.s32.totalorder %s387_s3, %s387_s3 }
  0x3f   :  { %304 = vmatpush3.bf16.msra.mxu0 %v303_v12  ;;  %p394_p13 = por %p393_p12, %p392_p11 }
  0x40   :  { %310 = vmatpush3.bf16.msra.mxu1 %v309_v13 }
  0x41   :  { %p395_p0 = pnand %p394_p13, %p388_p10 }
  0x42   :  { %286 = vmatmul.mubr.msk.f32.vlgmr.msra.gmra.mrb[0].mxu0 %vm75_vm1, %v63_v14 }
  0x43   :  { %297 = vmatmul.mubr.msk.f32.vlgmr.msra.gmra.mrb[0].mxu1 %vm75_vm1, %v63_v14 }
 0x115   :  { %v145_v17 = vpop.f32.mrb[0].mxu0 }
 0x116   :  { %v146_v18 = vadd.f32 %v263_v15, %v145_v17  ;;  %v228_v19 = vpop.f32.mrb[0].mxu1  ;;  %v287_v20 = vpop.f32.mrb[1].mxu0 }
 0x117   :  { %v229_v21 = vadd.f32 %v265_v16, %v228_v19  ;;  %v298_v22 = vpop.f32.mrb[1].mxu1 }
 0x118   :  { %150 = vst.msk [vmem:[#allocation8] sm:$0x3] %vm149_vm2, %v146_v18 }
 0x119   :  { %398 = shalt.err (!%p395_p0)
}
 0x11a   :  { %s399_s17 = scalar_lea.hbm %s563_s5, 32 }
 0x11b   :  { %p400_p1 = scmp.ne.s32.totalorder %s563_s5, %s399_s17  ;;  %p403_p2 = scmp.lt.u32.totalorder %s399_s17, %s563_s5 }
 0x11d   :  { %p405_p3 = pnand %p403_p2, %p400_p1 }
 0x11f   :  { %408 = shalt.err (!%p405_p3)
}
 0x120   :  { %242 = dma.vmem_to_hbm [thread:$0]  %s240_s11, 32, %s563_s5, [#allocation4]   ;;  %232 = vst.msk [vmem:[#allocation9] sm:$0x3] %vm149_vm2, %v229_v21 }
 0x121   :  { %s409_s23 = scalar_lea.vmem %s250_s15, 32  ;;  %p414_p5 = scmp.lt.s32.totalorder %s250_s15, %s250_s15 }
 0x122   :  { %p410_p4 = scmp.ne.s32.totalorder %s250_s15, %s409_s23  ;;  %p415_p6 = scmp.lt.s32.totalorder %s409_s23, %s409_s23 }
 0x124   :  { %p416_p7 = por %p415_p6, %p414_p5 }
 0x126   :  { %p417_p8 = pnand %p416_p7, %p410_p4 }
 0x128   :  { %420 = shalt.err (!%p417_p8)
}
 0x129   :  { %s421_s26 = scalar_lea.hbm %s564_s6, 32 }
 0x12a   :  { %p422_p9 = scmp.ne.s32.totalorder %s564_s6, %s421_s26  ;;  %p425_p10 = scmp.lt.u32.totalorder %s421_s26, %s564_s6 }
 0x12c   :  { %p427_p11 = pnand %p425_p10, %p422_p9 }
 0x12e   :  { %430 = shalt.err (!%p427_p11)
}
 0x12f   :  { %252 = dma.vmem_to_hbm [thread:$0]  %s250_s15, 32, %s564_s6, [#allocation10]  }
 0x130   :  { %435 = dma.done.wait [#allocation4], 32  }
 0x131   :  { %436 = vsyncadd [#allocation4], 4294967264 }
 0x132   :  { %437 = dma.done.wait [#allocation10], 32  }
 0x133   :  { %438 = vsyncadd [#allocation10], 4294967264 }
 0x134   :  { %259 = vsyncpa [#allocation3], 1 }
 0x135   :  { %260 = vsyncpa [#allocation6], 1 }
 0x136   :  { %261 = vsyncpa [#allocation4], 1 }
 0x137   :  { %262 = vsyncpa [#allocation10], 1 }

</bundles_post_ra>
